<compile_context>
chip_gen: v6e
topology: v6e:2x2x1
jax: 0.10.0
libtpu: 0.0.40
codegen_flags: <defaults>
</compile_context>

<pallas_src>
import functools
import math

import jax
import jax.numpy as jnp
from jax import lax
from jax.experimental import pallas as pl
from jax.experimental.pallas import tpu as pltpu


def _round_up(n, m):
    return (n + m - 1) // m * m


def _time2vec_kernel(x_ref, w_ref, bm_ref, o_ref):
    # x_ref : (TM, K*D)   grouped input rows
    # w_ref : (K*D, L)    block-diagonal expanded weight, L = K*D*E_pad (lane dense)
    # bm_ref: (2, L)      row 0 = flat bias, row 1 = 1.0 where the lane stays linear
    # o_ref : (TM, L)
    x = x_ref[...].astype(jnp.float32)
    aff = jnp.dot(
        x, w_ref[...],
        preferred_element_type=jnp.float32,
        precision=lax.Precision.HIGHEST,  # f32 contract; HIGH would silently drop to bf16
    ) + bm_ref[0:1, :]
    # TODO(synk): if a bundle dump shows the VPU (sin polynomial) is the binding
    # unit on v6e/v7x, replace jnp.sin with a bounded-domain Cody-Waite sin.
    out = jnp.where(bm_ref[1:2, :] > 0.5, aff, jnp.sin(aff))
    o_ref[...] = out.astype(o_ref.dtype)


def _choose_k_epad(D, E):
    """Row-group factor k and padded E so k*D*E_pad % 128 == 0 with small k."""
    k = 128 // math.gcd(D * E, 128)
    E_pad = E
    if k > 16:
        # Pad E just enough that D*E_pad gains a factor of 16  ->  k <= 8.
        need = 16
        e_step = need // math.gcd(D, need)
        E_pad = _round_up(E, e_step)
        k = 128 // math.gcd(D * E_pad, 128)
    # Never let the expanded weight (k*D, k*D*E_pad) blow up (grows as k^2).
    # For pathological shapes fall back to a smaller k (stores become masked,
    # correctness is unaffected).
    while k > 1 and (k * D) * (k * D * E_pad) * 4 > (2 << 20):
        k //= 2
    return k, E_pad


def _choose_tm(groups, KD, L):
    """Grouped rows per step: ~3 MiB output block, <=~12 MiB working set, >=2 steps."""
    if groups <= 8:
        return groups                            # single full-extent block
    tm = (3 << 20) // (4 * L)                    # ~3 MiB output block per buffer
    # v5e-safe cap: 2 buffers * (in + out + constant operands) * 4 B <= ~12 MiB.
    per_buf_elems = (12 << 20) // (2 * 4)
    tm_cap = (per_buf_elems - KD * L - 4 * L) // (KD + L)
    tm = min(tm, tm_cap)
    # Keep at least 2 grid steps so v7x's two TensorCores both get work.
    tm = min(tm, _round_up(-(-groups // 2), 8))
    tm = min(tm, _round_up(groups, 8))
    return max(8, (tm // 8) * 8)


@functools.partial(jax.jit, static_argnames=("out_dtype",))
def time2vec(x, embed_weight, embed_bias, *, out_dtype=None):
    """Time2Vec forward.  x: (B, S, D) -> (B, S, D*E), (D, E) = embed_weight.shape."""
    B, S, D = x.shape
    Dw, E = embed_weight.shape
    assert Dw == D
    out_dtype = x.dtype if out_dtype is None else out_dtype

    k, E_pad = _choose_k_epad(D, E)
    DEp = D * E_pad
    KD = k * D            # input lane width per grouped row
    L = k * DEp           # output lane width per grouped row

    rows = B * S
    rows_p = _round_up(rows, k)              # only pads when rows % k != 0 (< k rows)
    groups = rows_p // k
    tm = _choose_tm(groups, KD, L)
    grid = pl.cdiv(groups, tm)               # Pallas handles a non-dividing last block

    x2 = x.reshape(rows, D)
    if rows_p != rows:
        x2 = jnp.pad(x2, ((0, rows_p - rows), (0, 0)))
    xg = x2.reshape(groups, KD)

    w = embed_weight.astype(jnp.float32)
    b = embed_bias.astype(jnp.float32)
    if E_pad != E:
        w = jnp.pad(w, ((0, 0), (0, E_pad - E)))
        b = jnp.pad(b, ((0, 0), (0, E_pad - E)))
    # Per-feature block diagonal (D, D*E_pad): row i carries w[i,:] at cols i*E_pad..+E_pad.
    w_bd = (jnp.eye(D, dtype=jnp.float32)[:, :, None] * w[None, :, :]).reshape(D, DEp)
    # Block diagonal of k copies: (K*D, L).
    w_exp = (jnp.eye(k, dtype=jnp.float32)[:, None, :, None]
             * w_bd[None, :, None, :]).reshape(KD, L)
    b_flat = jnp.tile(b.reshape(1, DEp), (1, k))                        # (1, L)
    # Lane m = a*DEp + i*E_pad + j stays linear iff j == 0  <=>  m % E_pad == 0.
    lin_mask = (jnp.arange(L) % E_pad == 0).astype(jnp.float32).reshape(1, L)
    bm = jnp.concatenate([b_flat, lin_mask], axis=0)                    # (2, L)

    cost = pl.CostEstimate(
        flops=2 * groups * KD * L,
        transcendentals=groups * L,
        bytes_accessed=4 * (groups * KD + KD * L + 2 * L)
        + groups * L * jnp.dtype(out_dtype).itemsize,
    )

    out = pl.pallas_call(
        _time2vec_kernel,
        out_shape=jax.ShapeDtypeStruct((groups, L), out_dtype),
        grid_spec=pltpu.PrefetchScalarGridSpec(
            num_scalar_prefetch=0,
            grid=(grid,),
            in_specs=[
                pl.BlockSpec((tm, KD), lambda i: (i, 0)),
                pl.BlockSpec((KD, L), lambda i: (0, 0)),
                pl.BlockSpec((2, L), lambda i: (0, 0)),
            ],
            out_specs=pl.BlockSpec((tm, L), lambda i: (i, 0)),
        ),
        compiler_params=pltpu.CompilerParams(
            dimension_semantics=("parallel",),
        ),
        cost_estimate=cost,
    )(xg, w_exp, bm)

    # Contiguous unflatten of the grouped lane-dense layout back to (B, S, D*E).
    out = out.reshape(rows_p, DEp)
    if E_pad != E:
        out = out.reshape(rows_p, D, E_pad)[:, :, :E].reshape(rows_p, D * E)
    if rows_p != rows:
        out = out[:rows]
    return out.reshape(B, S, D * E)


def time2vec_reference(x, w, b):
    aff = x[..., :, None] * w[None, None, :, :] + b[None, None, :, :]
    aff = aff.at[..., 1:].set(jnp.sin(aff[..., 1:]))
    B, S = x.shape[:2]
    return aff.reshape(B, S, -1)


if __name__ == "__main__":
    # Small shapes consistent with the module: embed_dim % input_dim == 0.
    batch, seq_len, input_dim, embed_dim = 2, 8, 4, 32
    embed_per = embed_dim // input_dim  # = 8

    key = jax.random.PRNGKey(0)
    kx, kw, kb = jax.random.split(key, 3)

    x = jax.random.normal(kx, (batch, seq_len, input_dim), dtype=jnp.float32)
    embed_weight = jax.random.normal(kw, (input_dim, embed_per), dtype=jnp.float32)
    embed_bias = jax.random.normal(kb, (input_dim, embed_per), dtype=jnp.float32)

    out = jax.block_until_ready(time2vec(x, embed_weight, embed_bias))
    ref = time2vec_reference(x, embed_weight, embed_bias)

    assert out.shape == (batch, seq_len, embed_dim), out.shape
    assert jnp.allclose(out, ref, atol=1e-4, rtol=1e-4), "mismatch vs reference"

    print("KERNEL_OK")
</pallas_src>

<mosaic_0001>
module attributes {stable_mosaic.version = 11 : i64} {
  func.func @_time2vec_kernel(%arg0: i32, %arg1: memref<4x16xf32, #tpu.memory_space<vmem>>, %arg2: memref<16x128xf32, #tpu.memory_space<vmem>>, %arg3: memref<2x128xf32, #tpu.memory_space<vmem>>, %arg4: memref<4x128xf32, #tpu.memory_space<vmem>>) attributes {dimension_semantics = [#tpu.dimension_semantics<parallel>], iteration_bounds = array<i64: 1>, scalar_prefetch = 0 : i64, scratch_operands = 0 : i64, tpu.core_type = #tpu.core_type<tc>, window_params = [{transform_indices = @transform_0, window_bounds = array<i64: 4, 16>}, {pipeline_mode = #tpu.pipeline_mode<synchronous>, transform_indices = @transform_1, window_bounds = array<i64: 16, 128>}, {pipeline_mode = #tpu.pipeline_mode<synchronous>, transform_indices = @transform_2, window_bounds = array<i64: 2, 128>}, {transform_indices = @transform_3, window_bounds = array<i64: 4, 128>}]} {
    %c0 = arith.constant 0 : index
    %c0_0 = arith.constant 0 : index
    %0 = vector.load %arg1[%c0, %c0_0] : memref<4x16xf32, #tpu.memory_space<vmem>>, vector<4x16xf32>
    %c0_1 = arith.constant 0 : index
    %c0_2 = arith.constant 0 : index
    %1 = vector.load %arg2[%c0_1, %c0_2] : memref<16x128xf32, #tpu.memory_space<vmem>>, vector<16x128xf32>
    %cst = arith.constant dense<0.000000e+00> : vector<4x128xf32>
    %2 = tpu.matmul %0, %1, %cst {dimension_numbers = #tpu.dot_dimension_numbers<[1], [0], [0], [1], [0, 0, 1, 1], [], []>, precision = #tpu.contract_precision<fp32>} : vector<4x16xf32>, vector<16x128xf32>, vector<4x128xf32> -> vector<4x128xf32>
    %c0_3 = arith.constant 0 : index
    %c0_4 = arith.constant 0 : index
    %3 = vector.load %arg3[%c0_3, %c0_4] : memref<2x128xf32, #tpu.memory_space<vmem>>, vector<1x128xf32>
    %4 = vector.broadcast %3 : vector<1x128xf32> to vector<4x128xf32>
    %5 = arith.addf %2, %4 : vector<4x128xf32>
    %c1 = arith.constant 1 : index
    %c0_5 = arith.constant 0 : index
    %6 = vector.load %arg3[%c1, %c0_5] : memref<2x128xf32, #tpu.memory_space<vmem>>, vector<1x128xf32>
    %cst_6 = arith.constant 5.000000e-01 : f32
    %7 = vector.broadcast %cst_6 : f32 to vector<1x128xf32>
    %8 = arith.cmpf ogt, %6, %7 : vector<1x128xf32>
    %9 = math.sin %5 : vector<4x128xf32>
    %10 = vector.shape_cast %8 : vector<1x128xi1> to vector<1x128xi1>
    %11 = vector.broadcast %10 : vector<1x128xi1> to vector<4x128xi1>
    %12 = arith.select %11, %5, %9 : vector<4x128xi1>, vector<4x128xf32>
    %c0_7 = arith.constant 0 : index
    %c0_8 = arith.constant 0 : index
    %13 = vector.load %arg4[%c0_7, %c0_8] : memref<4x128xf32, #tpu.memory_space<vmem>>, vector<4x128xf32>
    tpu.vector_store %arg4[%c0_7, %c0_8], %12 {strides = array<i32>} : memref<4x128xf32, #tpu.memory_space<vmem>>, vector<4x128xf32>,
    return
  }
  func.func @transform_0(%arg0: i32) -> (i32, i32) {
    %c0_i32 = arith.constant 0 : i32
    %c0_i32_0 = arith.constant 0 : i32
    return %arg0, %c0_i32 : i32, i32
  }
  func.func @transform_1(%arg0: i32) -> (i32, i32) {
    %c0_i32 = arith.constant 0 : i32
    %c0_i32_0 = arith.constant 0 : i32
    %c0_i32_1 = arith.constant 0 : i32
    return %c0_i32, %c0_i32_0 : i32, i32
  }
  func.func @transform_2(%arg0: i32) -> (i32, i32) {
    %c0_i32 = arith.constant 0 : i32
    %c0_i32_0 = arith.constant 0 : i32
    %c0_i32_1 = arith.constant 0 : i32
    return %c0_i32, %c0_i32_0 : i32, i32
  }
  func.func @transform_3(%arg0: i32) -> (i32, i32) {
    %c0_i32 = arith.constant 0 : i32
    %c0_i32_0 = arith.constant 0 : i32
    return %arg0, %c0_i32 : i32, i32
  }
}

</mosaic_0001>

<bundles_post_ra>
// kernel: time2vec.1
= control target key start
LH: loop header
LB: loop body
LE: loop exit
PB: predicated region body
PF: predicated region fallthrough
CT: control target
= control target key end

     0   :  { %vm22_vm0 = vcmask 130048   ;;  %v685_v0 = vmov 0.0   ;;  %vm686_vm1 = vmmov 0   ;;  %v687_v49 = vmov 683565275   ;;  %s760_s1 = inlined_call_operand.vmem [shape: f32[16,128], index: 1, kind: input, shape index: {}]   ;;  %s761_s0 = inlined_call_operand.vmem [shape: f32[4,16], index: 0, kind: input, shape index: {}]   ;;  %s762_s2 = inlined_call_operand.vmem [shape: f32[2,128], index: 2, kind: input, shape index: {}]   ;;  %s763_s3 = inlined_call_operand.vmem [shape: f32[4,128], index: 3, kind: output, shape index: {}]  }
   0x1   :  { %626 = vmatprep.subr.mxu0 %v685_v0  ;;  %v16_v1 = vld [vmem:[%s760_s1 + $0x8] sm:$0xff]  ;;  %633 = vmatprep.subr.mxu1 %v685_v0  ;;  %v15_v2 = vld [vmem:[%s760_s1] sm:$0xff]  ;;  %v688_v51 = vmov 2475754826   ;;  %v689_v54 = vmov 2131351028  }
   0x2   :  { %v14_v3 = vld [vmem:[%s761_s0] sm:$0xf]  ;;  %v55_v4 = vand.u32 4294901760, %v16_v1  ;;  %v58_v5 = vand.u32 4294901760, %v15_v2  ;;  %630 = vmatprep.mubr.msk.f32.mxu0 %vm686_vm1, %v685_v0  ;;  %637 = vmatprep.mubr.msk.f32.mxu1 %vm686_vm1, %v685_v0  ;;  %v690_v57 = vmov 2102212464  }
   0x3   :  { %v24_v6 = vsel %vm22_vm0, %v14_v3, 0  ;;  %v603_v20 = vld [vmem:[%s762_s2] ss:$0 sm:$0xff]  ;;  %v691_v60 = vmov 920167782  }
   0x4   :  { %v93_v7 = vand.u32 4294901760, %v24_v6  ;;  %627 = vmatpush3.msra.mxu0 %v55_v4  ;;  %v133_v8 = vsub.f32 %v16_v1, %v55_v4  ;;  %v140_v9 = vsub.f32 %v15_v2, %v58_v5  ;;  %v692_v63 = vmov 1326507024  }
   0x5   :  { %628 = vmatprep.subr.mxu0 %v685_v0 }
   0x6   :  { %v94_v10 = vsub.f32 %v24_v6, %v93_v7  ;;  %629 = vmatpush3.msra.mxu0 %v58_v5  ;;  %v134_v11 = vand.u32 4294901760, %v133_v8  ;;  %v141_v12 = vand.u32 4294901760, %v140_v9 }
   0x7   :  { %640 = vmatprep.subr.mxu0 %v685_v0 }
   0x8   :  { %v95_v13 = vand.u32 4294901760, %v94_v10  ;;  %v135_v14 = vsub.f32 %v133_v8, %v134_v11  ;;  %v142_v15 = vsub.f32 %v140_v9, %v141_v12 }
   0xa   :  { %v96_v16 = vsub.f32 %v94_v10, %v95_v13  ;;  %v136_v17 = vand.u32 4294901760, %v135_v14  ;;  %v143_v18 = vand.u32 4294901760, %v142_v15 }
   0xc   :  { %v97_v19 = vand.u32 4294901760, %v96_v16  ;;  %634 = vmatpush3.msra.mxu1 %v136_v17 }
   0xd   :  { %635 = vmatprep.subr.mxu1 %v685_v0 }
   0xe   :  { %631 = vmatmul.mubr.f32.vlgmr.msra.gmra.mxu0 %v97_v19  ;;  %636 = vmatpush3.msra.mxu1 %v143_v18 }
   0xf   :  { %641 = vmatpush3.msra.mxu0 %v133_v8  ;;  %638 = vmatmul.mubr.f32.vlgmr.msra.gmra.mxu1 %v93_v7 }
  0x10   :  { %642 = vmatprep.subr.mxu0 %v685_v0  ;;  %647 = vmatprep.subr.mxu1 %v685_v0 }
  0x11   :  { %643 = vmatpush3.msra.mxu0 %v140_v9  ;;  %644 = vmatprep.mubr.msk.f32.mxu0 %vm686_vm1, %v685_v0 }
  0x12   :  { %648 = vmatpush3.msra.mxu1 %v55_v4  ;;  %645 = vmatmul.mubr.f32.vlgmr.msra.gmra.mxu0 %v94_v10 }
  0x13   :  { %649 = vmatprep.subr.mxu1 %v685_v0  ;;  %654 = vmatprep.subr.mxu0 %v685_v0 }
  0x14   :  { %650 = vmatpush3.msra.mxu1 %v58_v5  ;;  %651 = vmatprep.mubr.msk.f32.mxu1 %vm686_vm1, %v685_v0 }
  0x15   :  { %655 = vmatpush3.msra.mxu0 %v134_v11  ;;  %652 = vmatmul.mubr.f32.vlgmr.msra.gmra.mxu1 %v95_v13 }
  0x16   :  { %656 = vmatprep.subr.mxu0 %v685_v0  ;;  %661 = vmatprep.subr.mxu1 %v685_v0 }
  0x17   :  { %657 = vmatpush3.msra.mxu0 %v141_v12  ;;  %658 = vmatprep.mubr.msk.f32.mxu0 %vm686_vm1, %v685_v0 }
  0x18   :  { %662 = vmatpush3.msra.mxu1 %v55_v4  ;;  %659 = vmatmul.mubr.f32.vlgmr.msra.gmra.mxu0 %v93_v7 }
  0x19   :  { %663 = vmatprep.subr.mxu1 %v685_v0  ;;  %665 = vmatprep.mubr.msk.f32.mxu1 %vm686_vm1, %v685_v0 }
  0x1a   :  { %664 = vmatpush3.msra.mxu1 %v58_v5 }
  0x1b   :  { %666 = vmatmul.mubr.f32.vlgmr.msra.gmra.mxu1 %v93_v7 }
  0xce   :  { %v99_v21 = vpop.f32.mrf.mxu0 }
  0xcf   :  { %v100_v22 = vadd.f32 %v603_v20, %v99_v21  ;;  %v180_v24 = vpop.f32.mrf.mxu1 }
  0xd0   :  { %v632_v23 = vpop.f32.mrf.mxu0 }
  0xd1   :  { %v181_v25 = vadd.f32 %v180_v24, %v100_v22  ;;  %v639_v26 = vpop.f32.mrf.mxu1 }
  0xd2   :  { %v256_v27 = vpop.f32.mrf.mxu0 }
  0xd3   :  { %v257_v28 = vadd.f32 %v256_v27, %v181_v25 }
  0xd4   :  { %v646_v29 = vpop.f32.mrf.mxu0 }
  0xd5   :  { %v331_v30 = vpop.f32.mrf.mxu1 }
  0xd6   :  { %v332_v31 = vadd.f32 %v331_v30, %v257_v28 }
  0xd7   :  { %v653_v32 = vpop.f32.mrf.mxu1 }
  0xd8   :  { %v408_v33 = vpop.f32.mrf.mxu0 }
  0xd9   :  { %v409_v34 = vadd.f32 %v408_v33, %v332_v31 }
  0xda   :  { %v660_v35 = vpop.f32.mrf.mxu0 }
  0xdb   :  { %v481_v36 = vpop.f32.mrf.mxu1 }
  0xdc   :  { %v732_v37 = vadd.f32 %v481_v36, %v409_v34 }
  0xdd   :  { %v667_v38 = vpop.f32.mrf.mxu1 }
  0xde   :  { %v490_v39 = vand.u32 2139095040, %v732_v37  ;;  %v487_v43 = vand.u32 2147483647, %v732_v37  ;;  %vm489_vm9 = vcmp.lt.s32.totalorder %v732_v37, 0  ;;  %vm579_vm0 = vweird.f32 %v732_v37 }
  0xe0   :  { %v491_v40 = vshrl.u32 %v490_v39, 23  ;;  %v494_v46 = vand.u32 8388607, %v487_v43  ;;  %vm488_vm10 = vcmp.le.f32.partialorder %v487_v43, 0.7853982 }
  0xe2   :  { %v604_v41 = vadd.s32 4294967169, %v491_v40  ;;  %v495_v1 = vor.u32 8388608, %v494_v46 }
  0xe4   :  { %v497_v42 = vadd.s32 1, %v604_v41  ;;  %v535_v15 = vshll.u32 %v495_v1, 8 }
  0xe6   :  { %vm498_vm2 = vcmp.gt.s32.totalorder %v497_v42, 0 }
  0xe7   :  { %v499_v44 = vsel %vm498_vm2, %v497_v42, 0 }
  0xe8   :  { %v501_v45 = vand.u32 31, %v499_v44  ;;  %v500_v48 = vshrl.u32 %v499_v44, 5 }
  0xea   :  { %v502_v47 = vsub.s32 32, %v501_v45  ;;  %v504_v50 = vshll.u32 %v687_v49, %v501_v45  ;;  %v507_v52 = vshll.u32 %v688_v51, %v501_v45  ;;  %v510_v56 = vshll.u32 %v689_v54, %v501_v45 }
  0xeb   :  { %v513_v59 = vshll.u32 %v690_v57, %v501_v45  ;;  %v516_v62 = vshll.u32 %v691_v60, %v501_v45  ;;  %vm519_vm3 = vcmp.lt.s32.totalorder %v500_v48, 1  ;;  %vm522_vm4 = vcmp.lt.s32.totalorder %v500_v48, 4 }
  0xec   :  { %v505_v53 = vshrl.u32 %v688_v51, %v502_v47  ;;  %v508_v55 = vshrl.u32 %v689_v54, %v502_v47  ;;  %v511_v58 = vshrl.u32 %v690_v57, %v502_v47  ;;  %v514_v61 = vshrl.u32 %v691_v60, %v502_v47 }
  0xed   :  { %v517_v0 = vshrl.u32 %v692_v63, %v502_v47  ;;  %v503_v10 = vshrl.u32 %v687_v49, %v502_v47  ;;  %vm521_vm5 = vcmp.lt.s32.totalorder %v500_v48, 3  ;;  %vm520_vm6 = vcmp.lt.s32.totalorder %v500_v48, 2 }
  0xee   :  { %v506_v2 = vor.u32 %v505_v53, %v504_v50  ;;  %v509_v3 = vor.u32 %v508_v55, %v507_v52  ;;  %v512_v4 = vor.u32 %v511_v58, %v510_v56  ;;  %v515_v5 = vor.u32 %v514_v61, %v513_v59  ;;  %v485_v58 = vld [vmem:[%s762_s2 + $0x1] sm:$0x1] }
  0xef   :  { %v518_v6 = vor.u32 %v517_v0, %v516_v62  ;;  %v592_v56 = vlaneseq  ;;  %vm486_vm11 = vcmp.gt.f32.partialorder %v485_v58, 0.5  ;;  %v693_v63 = vmov 0  }
  0xf0   :  { %v524_v7 = vsel %vm522_vm4, %v512_v4, 2102212464  ;;  %v527_v8 = vsel %vm519_vm3, %v506_v2, %v509_v3  ;;  %v531_v9 = vsel %vm519_vm3, %v509_v3, %v512_v4  ;;  %v528_v11 = vsel %vm522_vm4, %v515_v5, 920167782 }
  0xf1   :  { %v532_v12 = vsel %vm522_vm4, %v518_v6, 1326507024  ;;  %v529_v13 = vsel %vm521_vm5, %v512_v4, %v528_v11  ;;  %v523_v16 = vsel %vm519_vm3, %v503_v10, %v506_v2  ;;  %v525_v17 = vsel %vm521_vm5, %v509_v3, %v524_v7 }
  0xf2   :  { %v533_v14 = vsel %vm521_vm5, %v515_v5, %v532_v12  ;;  %v530_v18 = vsel %vm520_vm6, %v527_v8, %v529_v13  ;;  %v526_v24 = vsel %vm520_vm6, %v523_v16, %v525_v17  ;;  %v593_v60 = vshrl.u32 %v592_v56, 7 }
  0xf3   :  { %v534_v19 = vsel %vm520_vm6, %v531_v9, %v533_v14  ;;  %v741_v22 = vmul.u32.u64.low %v535_v15, %v530_v18  ;;  %v742_v23 = vmul.u32.u64.high %v535_v15, %v530_v18, %v741_v22  ;;  %v542_v26 = vmul.u32 %v535_v15, %v526_v24 }
  0xf4   :  { %v738_v20 = vmul.u32.u64.low %v535_v15, %v534_v19  ;;  %v739_v21 = vmul.u32.u64.high %v535_v15, %v534_v19, %v738_v20  ;;  %v594_v62 = vsub.s32 0, %v593_v60  ;;  %v591_v0 = vsel %vm486_vm11, 1, %v693_v63 }
  0xf5   :  { %v545_v25 = vadd.s32 1, %v742_v23 }
  0xf6   :  { %vm544_vm7 = vc.u32 %v739_v21, %v741_v22  ;;  %v543_v39 = vadd.s32 %v741_v22, %v739_v21  ;;  %v595_v2 = vrot.slane %v591_v0, %v594_v62 }
  0xf7   :  { %v546_v27 = vsel %vm544_vm7, %v545_v25, %v742_v23 }
  0xf8   :  { %v547_v28 = vadd.s32 %v546_v27, %v542_v26  ;;  %vm596_vm14 = vcmp.eq.s32.totalorder %v595_v2, 1 }
  0xfa   :  { %v548_v29 = vadd.s32 536870912, %v547_v28 }
  0xfc   :  { %v549_v30 = vshrl.u32 %v548_v29, 30 }
  0xfe   :  { %v550_v31 = vshll.u32 %v549_v30, 30  ;;  %v573_v53 = vsub.s32 4, %v549_v30 }
 0x100   :  { %v551_v32 = vsub.s32 %v547_v28, %v550_v31  ;;  %v574_v57 = vsel %vm489_vm9, %v573_v53, %v549_v30 }
 0x101   :  { %v576_v59 = vsel %vm488_vm10, 0, %v574_v57 }
 0x102   :  { %v553_v33 = vsub.s32 0, %v551_v32  ;;  %v580_v61 = vadd.s32 3, %v576_v59 }
 0x104   :  { %v605_v34 = vmin.u32 %v553_v33, %v551_v32  ;;  %v581_v1 = vand.u32 3, %v580_v61 }
 0x106   :  { %v555_v35 = vclz %v605_v34  ;;  %vm586_vm12 = vcmp.eq.s32.totalorder %v581_v1, 2  ;;  %vm583_vm13 = vcmp.eq.s32.totalorder %v581_v1, 0  ;;  %vm582_vm15 = vcmp.lt.s32.totalorder %v581_v1, 2 }
 0x108   :  { %v606_v36 = vadd.s32 4294967294, %v555_v35 }
 0x10a   :  { %vm607_vm8 = vcmp.lt.s32.totalorder %v606_v36, 0 }
 0x10b   :  { %v558_v38 = vsel %vm607_vm8, 0, %v606_v36 }
 0x10c   :  { %v559_v40 = vsub.s32 32, %v558_v38  ;;  %v563_v41 = vsub.s32 4294967266, %v558_v38  ;;  %v560_v42 = vshll.u32 %v551_v32, %v558_v38 }
 0x10e   :  { %v561_v44 = vshrl.u32 %v543_v39, %v559_v40  ;;  %v564_v45 = vadd.s32 127, %v563_v41 }
 0x110   :  { %v562_v46 = vor.u32 %v561_v44, %v560_v42  ;;  %v565_v47 = vshll.u32 %v564_v45, 23 }
 0x112   :  { %v566_v48 = vor.u32 4788187, %v565_v47  ;;  %v569_v50 = vcvt.s32.f32 %v562_v46 }
 0x114   :  { %v567_v49 = vand.u32 2147483647, %v566_v48 }
 0x116   :  { %v570_v51 = vmul.f32 %v569_v50, %v567_v49 }
 0x118   :  { %v571_v52 = vxor.u32 2147483648, %v570_v51 }
 0x11a   :  { %v572_v54 = vsel %vm489_vm9, %v571_v52, %v570_v51 }
 0x11b   :  { %v575_v55 = vsel %vm488_vm10, %v732_v37, %v572_v54 }
 0x11c   :  { %681 = vcosq.f32 %v575_v55 }
 0x11d   :  { %683 = vsinq.f32 %v575_v55 }
 0x129   :  { %v682_v43 = vpop.eup %681 }
 0x12a   :  { %v684_v3 = vpop.eup %683  ;;  %v587_v4 = vxor.u32 2147483648, %v682_v43 }
 0x12b   :  { %v584_v5 = vxor.u32 2147483648, %v684_v3 }
 0x12c   :  { %v588_v6 = vsel %vm586_vm12, %v587_v4, %v684_v3 }
 0x12d   :  { %v585_v7 = vsel %vm583_vm13, %v682_v43, %v584_v5 }
 0x12e   :  { %v589_v8 = vsel %vm582_vm15, %v585_v7, %v588_v6 }
 0x12f   :  { %v590_v9 = vsel %vm579_vm0, nan, %v589_v8 }
 0x130   :  { %v597_v10 = vsel %vm596_vm14, %v732_v37, %v590_v9 }
 0x131   :  { %598 = vst [vmem:[%s763_s3] sm:$0xf] %v597_v10 }

</bundles_post_ra>
